<compile_context>
chip_gen: v6e
topology: v6e:2x2x1
jax: 0.10.0
libtpu: 0.0.40
codegen_flags: <defaults>
</compile_context>

<pallas_src>
import functools

import jax
import jax.numpy as jnp
from jax.experimental import pallas as pl
from jax.experimental.pallas import tpu as pltpu

_EPS = 1e-12  # matches torch.nn.functional.normalize default eps


def _l2_normalize_kernel(x_ref, o_ref, *, upcast_full_block):
    # x_ref block: (Bt, C, HWt); C (reduction axis) is fully inside the block.
    x = x_ref[...]
    if upcast_full_block:
        # f32 inputs (no-op cast) or chips without a bf16 VPU (v5e).
        xf = x.astype(jnp.float32)
        sumsq = jnp.sum(xf * xf, axis=1, keepdims=True)          # (Bt, 1, HWt)
        # 1/max(||x||, eps) == rsqrt(max(sumsq, eps^2))  (sqrt monotone)
        inv = jax.lax.rsqrt(jnp.maximum(sumsq, jnp.float32(_EPS * _EPS)))
        o_ref[...] = (xf * inv).astype(o_ref.dtype)
    else:
        # Low-precision inputs on bf16-capable VPUs: square in the input
        # dtype, accumulate in f32 on the reduced tensor only (no full-block
        # f32 temporary), multiply back in the input dtype.
        sumsq = jnp.sum(x * x, axis=1, keepdims=True, dtype=jnp.float32)
        inv = jax.lax.rsqrt(jnp.maximum(sumsq, jnp.float32(_EPS * _EPS)))
        o_ref[...] = (x * inv.astype(x.dtype)).astype(o_ref.dtype)


def _round_up(x, m):
    return -(-x // m) * m


def _chip_info():
    """(num_tensorcores, target padded block bytes, vmem_limit_bytes or None)."""
    try:
        kind = jax.devices()[0].device_kind.lower()
    except Exception:  # pragma: no cover - defensive
        kind = ""
    if "v7" in kind:
        # 2 TC/chip, 64 MiB physical VMEM, ~3.2 TB/s HBM: bigger blocks pay.
        return 2, 3 << 20, 48 << 20
    if "v6" in kind:
        # 1 TC, 128 MiB VMEM (32 MiB default scoped), ~1.4 TB/s HBM.
        return 1, 2 << 20, None
    # v5e / unknown: conservative (16 MiB default scoped VMEM, ~0.8 TB/s HBM).
    return 1, 1 << 20, None


def _pick_block(B, C, HW, itemsize, target_bytes):
    """Choose (Bt, HWt) so each block carries ~target_bytes of PADDED payload."""
    pack = (4 // max(1, itemsize)) * 8        # sublane pack: f32=8, bf16=16, i8=32
    c_pad = _round_up(C, pack)
    hw_pad = _round_up(HW, 128)
    row_bytes = c_pad * hw_pad * itemsize     # one batch-row as it sits in VMEM
    if row_bytes <= target_bytes:
        hwt = HW                              # full last dim (always legal)
        bt = max(1, min(B, target_bytes // max(1, row_bytes)))
    else:
        # Split the lane axis in multiples of 128 (required when not full-extent).
        hwt = max(128, (target_bytes // (c_pad * itemsize)) // 128 * 128)
        hwt = min(hwt, HW)
        bt = 1
    return bt, hwt


def last_layer_forward(x):
    """x: (B, C, H, W) -> L2-normalized along C (dim=1), same shape/dtype."""
    B, C, H, W = x.shape
    HW = H * W
    x3 = x.reshape(B, C, HW)                  # free reshape, no transpose

    itemsize = jnp.dtype(x.dtype).itemsize
    num_cores, target_bytes, vmem_limit = _chip_info()

    Bt, HWt = _pick_block(B, C, HW, itemsize, target_bytes)
    gb, gs = pl.cdiv(B, Bt), pl.cdiv(HW, HWt)

    if num_cores >= 2:
        # Keep >= 2 steps per TensorCore so both cores get work and each core
        # retains DMA/compute prefetch overlap.  Split batch first, then HW.
        target_steps = 2 * num_cores
        while gb * gs < target_steps and Bt > 1:
            Bt = -(-Bt // 2)
            gb = pl.cdiv(B, Bt)
        while gb * gs < target_steps and HWt > 128:
            HWt = max(128, _round_up(-(-HWt // 2), 128))
            gs = pl.cdiv(HW, HWt)

    # Full-block f32 upcast only when it is free (f32 input) or required
    # (v5e has no bf16 VPU).  Otherwise keep the math lane-narrow.
    is_v5e = num_cores == 1 and target_bytes == (1 << 20)
    upcast_full_block = (x.dtype == jnp.float32) or is_v5e

    kernel = functools.partial(
        _l2_normalize_kernel, upcast_full_block=upcast_full_block
    )

    cp_kwargs = dict(dimension_semantics=("parallel", "parallel"))
    if vmem_limit is not None:
        cp_kwargs["vmem_limit_bytes"] = vmem_limit

    cost = pl.CostEstimate(
        flops=3 * B * C * HW,                 # square + accumulate + scale
        transcendentals=B * HW,               # one rsqrt per (batch, pixel)
        bytes_accessed=2 * B * C * HW * itemsize,
    )

    out3 = pl.pallas_call(
        kernel,
        out_shape=jax.ShapeDtypeStruct((B, C, HW), x.dtype),
        grid_spec=pltpu.PrefetchScalarGridSpec(
            num_scalar_prefetch=0,
            grid=(gb, gs),
            in_specs=[pl.BlockSpec((Bt, C, HWt), lambda b, s: (b, 0, s))],
            out_specs=pl.BlockSpec((Bt, C, HWt), lambda b, s: (b, 0, s)),
        ),
        compiler_params=pltpu.CompilerParams(**cp_kwargs),
        cost_estimate=cost,
    )(x3)

    return out3.reshape(B, C, H, W)


if __name__ == "__main__":
    key = jax.random.PRNGKey(0)
    B, C, H, W = 2, 4, 16, 16
    x = jax.random.normal(key, (B, C, H, W), dtype=jnp.float32)

    out = jax.block_until_ready(last_layer_forward(x))

    # reference check (pure JAX, torch F.normalize semantics)
    norm = jnp.sqrt(jnp.sum(x * x, axis=1, keepdims=True))
    ref = x / jnp.maximum(norm, _EPS)
    assert out.shape == (B, C, H, W)
    assert out.dtype == x.dtype
    assert jnp.allclose(out, ref, atol=1e-5, rtol=1e-5), float(
        jnp.max(jnp.abs(out - ref))
    )

    # small bf16 sanity check (exercises the non-upcast path on v6e/v7x)
    xb = x.astype(jnp.bfloat16)
    outb = jax.block_until_ready(last_layer_forward(xb))
    refb = (xb.astype(jnp.float32)
            / jnp.maximum(jnp.sqrt(jnp.sum(xb.astype(jnp.float32) ** 2,
                                           axis=1, keepdims=True)), _EPS))
    assert outb.dtype == jnp.bfloat16
    assert jnp.allclose(outb.astype(jnp.float32), refb, atol=2e-2, rtol=2e-2)

    print("KERNEL_OK")
</pallas_src>

<mosaic_0001>
module attributes {stable_mosaic.version = 11 : i64} {
  func.func @_l2_normalize_kernel(%arg0: i32, %arg1: i32, %arg2: memref<2x4x256xf32, #tpu.memory_space<vmem>>, %arg3: memref<2x4x256xf32, #tpu.memory_space<vmem>>) attributes {dimension_semantics = [#tpu.dimension_semantics<parallel>, #tpu.dimension_semantics<parallel>], iteration_bounds = array<i64: 1, 1>, scalar_prefetch = 0 : i64, scratch_operands = 0 : i64, tpu.core_type = #tpu.core_type<tc>, window_params = [{transform_indices = @transform_0, window_bounds = array<i64: 2, 4, 256>}, {transform_indices = @transform_1, window_bounds = array<i64: 2, 4, 256>}]} {
    %c0 = arith.constant 0 : index
    %c0_0 = arith.constant 0 : index
    %c0_1 = arith.constant 0 : index
    %0 = vector.load %arg2[%c0, %c0_0, %c0_1] : memref<2x4x256xf32, #tpu.memory_space<vmem>>, vector<2x4x256xf32>
    %1 = arith.mulf %0, %0 : vector<2x4x256xf32>
    %cst = arith.constant dense<0.000000e+00> : vector<2x256xf32>
    %2 = vector.multi_reduction <add>, %1, %cst [1] : vector<2x4x256xf32> to vector<2x256xf32>
    %3 = vector.shape_cast %2 : vector<2x256xf32> to vector<2x1x256xf32>
    %cst_2 = arith.constant 1.000000e-24 : f32
    %4 = vector.broadcast %cst_2 : f32 to vector<2x1x256xf32>
    %5 = arith.maximumf %3, %4 : vector<2x1x256xf32>
    %6 = math.rsqrt %5 : vector<2x1x256xf32>
    %7 = vector.broadcast %6 : vector<2x1x256xf32> to vector<2x4x256xf32>
    %8 = arith.mulf %0, %7 : vector<2x4x256xf32>
    %c0_3 = arith.constant 0 : index
    %c0_4 = arith.constant 0 : index
    %c0_5 = arith.constant 0 : index
    %9 = vector.load %arg3[%c0_3, %c0_4, %c0_5] : memref<2x4x256xf32, #tpu.memory_space<vmem>>, vector<2x4x256xf32>
    tpu.vector_store %arg3[%c0_3, %c0_4, %c0_5], %8 {strides = array<i32>} : memref<2x4x256xf32, #tpu.memory_space<vmem>>, vector<2x4x256xf32>,
    return
  }
  func.func @transform_0(%arg0: i32, %arg1: i32) -> (i32, i32, i32) {
    %c0_i32 = arith.constant 0 : i32
    %c0_i32_0 = arith.constant 0 : i32
    return %arg0, %c0_i32, %arg1 : i32, i32, i32
  }
  func.func @transform_1(%arg0: i32, %arg1: i32) -> (i32, i32, i32) {
    %c0_i32 = arith.constant 0 : i32
    %c0_i32_0 = arith.constant 0 : i32
    return %arg0, %c0_i32, %arg1 : i32, i32, i32
  }
}

</mosaic_0001>

<bundles_post_ra>
// kernel: tpu_custom_call.1
= control target key start
LH: loop header
LB: loop body
LE: loop exit
PB: predicated region body
PF: predicated region fallthrough
CT: control target
= control target key end

     0   :  { %6 = vsyncpa [#allocation3], 0  ;;  %s181_s0 = inlined_call_operand.hbm [shape: f32[2,4,256], index: 0, kind: input, shape index: {}]   ;;  %s182_s1 = inlined_call_operand.hbm [shape: f32[2,4,256], index: 1, kind: output, shape index: {}]  }
   0x1   :  { %7 = vsyncpa [#allocation4], 0  ;;  %s155_s6 = smov [#allocation2]  }
   0x2   :  { %s13_s7 = sshll.u32 %s155_s6, 4  ;;  %s14_s7 = int_to_ptr.vmem [resolvable:$true] %s13_s7 }
   0x3   :  { %s119_s8 = scalar_lea.vmem %s14_s7, 256  ;;  %p124_p1 = scmp.lt.s32.totalorder %s14_s7, %s14_s7 }
   0x4   :  { %p120_p0 = scmp.ne.s32.totalorder %s14_s7, %s119_s8  ;;  %p125_p2 = scmp.lt.s32.totalorder %s119_s8, %s119_s8 }
   0x6   :  { %p126_p3 = por %p125_p2, %p124_p1 }
   0x8   :  { %p127_p4 = pnand %p126_p3, %p120_p0 }
   0xa   :  { %130 = shalt.err (!%p127_p4)
}
   0xb   :  { %s156_s9 = smov 128   ;;  %s157_s10 = smov 8  }
   0xc   :  { %19 = dma.hbm_to_vmem [thread:$0]  %s181_s0, 256, %s14_s7, [#allocation3], %s156_s9, %s156_s9, %s157_s10  }
   0xd   :  { %151 = dma.done.wait [#allocation3], 256  }
   0xe   :  { %152 = vsyncadd [#allocation3], 4294967040  ;;  %v23_v0 = vld [vmem:[#allocation2] sm:$0xff]  ;;  %vm33_vm0 = vcmask 1043456   ;;  %v24_v1 = vld [vmem:[#allocation2 + $0x8] sm:$0xff]  ;;  %s158_s0 = smov [#allocation5]  }
   0xf   :  { %v25_v2 = vmul.f32 %v23_v0, %v23_v0  ;;  %v26_v3 = vmul.f32 %v24_v1, %v24_v1  ;;  %s87_s13 = sshll.u32 %s158_s0, 4  ;;  %s88_s13 = int_to_ptr.vmem [resolvable:$true] %s87_s13 }
  0x10   :  { %s131_s14 = scalar_lea.vmem %s88_s13, 256  ;;  %p136_p6 = scmp.lt.s32.totalorder %s88_s13, %s88_s13 }
  0x11   :  { %v29_v4 = vcombine.high %v25_v2, %v25_v2  ;;  %v34_v5 = vsel %vm33_vm0, %v25_v2, 0.0  ;;  %v30_v6 = vcombine.high %v26_v3, %v26_v3  ;;  %v48_v7 = vsel %vm33_vm0, %v26_v3, 0.0  ;;  %p132_p5 = scmp.ne.s32.totalorder %s88_s13, %s131_s14  ;;  %p137_p7 = scmp.lt.s32.totalorder %s131_s14, %s131_s14 }
  0x12   :  { %v35_v8 = vrot.slane %v34_v5, 4  ;;  %v49_v9 = vrot.slane %v48_v7, 4 }
  0x13   :  { %v41_v10 = vsel %vm33_vm0, %v29_v4, 0.0  ;;  %v55_v11 = vsel %vm33_vm0, %v30_v6, 0.0  ;;  %p138_p8 = por %p137_p7, %p136_p6 }
  0x14   :  { %v36_v12 = vadd.f32 %v35_v8, %v34_v5  ;;  %v42_v13 = vrot.slane %v41_v10, 4  ;;  %v50_v14 = vadd.f32 %v49_v9, %v48_v7  ;;  %v56_v15 = vrot.slane %v55_v11, 4 }
  0x15   :  { %p139_p9 = pnand %p138_p8, %p132_p5 }
  0x16   :  { %v37_v16 = vrot.slane %v36_v12, 2  ;;  %v43_v17 = vadd.f32 %v42_v13, %v41_v10  ;;  %v51_v18 = vrot.slane %v50_v14, 2  ;;  %v57_v19 = vadd.f32 %v56_v15, %v55_v11 }
  0x18   :  { %v38_v20 = vadd.f32 %v37_v16, %v36_v12  ;;  %v44_v21 = vrot.slane %v43_v17, 2  ;;  %v52_v22 = vadd.f32 %v51_v18, %v50_v14  ;;  %v58_v23 = vrot.slane %v57_v19, 2 }
  0x1a   :  { %v39_v24 = vrot.slane %v38_v20, 1  ;;  %v45_v25 = vadd.f32 %v44_v21, %v43_v17  ;;  %v53_v26 = vrot.slane %v52_v22, 1  ;;  %v59_v27 = vadd.f32 %v58_v23, %v57_v19 }
  0x1c   :  { %v40_v28 = vadd.f32 %v39_v24, %v38_v20  ;;  %v46_v29 = vrot.slane %v45_v25, 1  ;;  %v54_v30 = vadd.f32 %v53_v26, %v52_v22  ;;  %v60_v31 = vrot.slane %v59_v27, 1 }
  0x1e   :  { %v47_v32 = vadd.f32 %v46_v29, %v45_v25  ;;  %v62_v33 = vmax.f32 %v40_v28, 1e-24  ;;  %v61_v34 = vadd.f32 %v60_v31, %v59_v27  ;;  %v64_v35 = vmax.f32 %v54_v30, 1e-24 }
  0x20   :  { %v63_v36 = vmax.f32 %v47_v32, 1e-24  ;;  %103 = vrsqrt.f32 %v62_v33  ;;  %v65_v37 = vmax.f32 %v61_v34, 1e-24 }
  0x21   :  { %105 = vrsqrt.f32 %v64_v35 }
  0x22   :  { %107 = vrsqrt.f32 %v63_v36 }
  0x23   :  { %109 = vrsqrt.f32 %v65_v37 }
  0x2d   :  { %v104_v38 = vpop.eup %103 }
  0x2e   :  { %v106_v39 = vpop.eup %105 }
  0x2f   :  { %v108_v40 = vpop.eup %107 }
  0x30   :  { %v110_v41 = vpop.eup %109  ;;  %v74_v42 = vcombine.low %v104_v38, %v108_v40 }
  0x31   :  { %v75_v43 = vcombine.low %v106_v39, %v110_v41 }
  0x32   :  { %v78_v44 = vmul.f32 %v74_v42, %v23_v0 }
  0x33   :  { %v79_v45 = vmul.f32 %v75_v43, %v24_v1 }
  0x34   :  { %80 = vst [vmem:[#allocation5] sm:$0xff] %v78_v44 }
  0x35   :  { %81 = vst [vmem:[#allocation5 + $0x8] sm:$0xff] %v79_v45 }
  0x36   :  { %142 = shalt.err (!%p139_p9)
}
  0x37   :  { %93 = dma.vmem_to_hbm [thread:$0]  %s88_s13, 256, %s182_s1, [#allocation4], %s156_s9, %s156_s9, %s157_s10  }
  0x38   :  { %153 = dma.done.wait [#allocation4], 256  }
  0x39   :  { %154 = vsyncadd [#allocation4], 4294967040 }
  0x3a   :  { %97 = vsyncpa [#allocation3], 1 }
  0x3b   :  { %98 = vsyncpa [#allocation4], 1 }

</bundles_post_ra>
